<compile_context>
chip_gen: v6e
topology: v6e:2x2x1
jax: 0.10.0
libtpu: 0.0.40
codegen_flags: <defaults>
</compile_context>

<pallas_src>
import functools

import jax
import jax.numpy as jnp
from jax.experimental import pallas as pl
from jax.experimental.pallas import tpu as pltpu

_VMEM_LIMIT = 32 * 1024 * 1024  # <= default scoped VMEM on v6e/v7x, raises v5e's 16 MiB


def _pick_tile(n, target):
    """Largest 128-aligned divisor of n that is <= target, else the full extent."""
    if n <= target:
        return n
    t = (target // 128) * 128
    while t >= 128:
        if n % t == 0:
            return t
        t -= 128
    return n


# ----------------------------------------------------------------------------
# Kernel 1: batched projection over all heads (+ folded attention vectors)
# ----------------------------------------------------------------------------
def proj_kernel(x_ref, w_ref, wh_ref, s_ref, *, hf):
    # One wide MXU matmul: [TILE_P, F_in] @ [F_in, H*F_out + 2H]
    prod = jnp.dot(x_ref[...], w_ref[...], preferred_element_type=jnp.float32)
    wh_ref[...] = prod[:, :hf]          # Wh for all heads, lane dense
    s_ref[...] = prod[:, hf:]           # [src scores | dst scores] per head


# ----------------------------------------------------------------------------
# Kernel 2: masked attention, row-tiled, all heads per tile, lane-dense output
# ----------------------------------------------------------------------------
def attn_kernel(adj_ref, wh_ref, srow_ref, sall_ref, out_ref, *,
                nheads, f_out, alpha, mode):
    neg = jnp.float32(-9e15)
    mask = adj_ref[...] > 0                      # [TILE_M, N]   (adj is int8)
    srow = srow_ref[...].astype(jnp.float32)     # [TILE_M, 2H]  this tile's rows
    sall = sall_ref[...].astype(jnp.float32)     # [N, 2H]       all rows (key side)

    cols = []
    for h in range(nheads):
        # e[i, j] = LeakyReLU( Wh_i . a_src  +  Wh_j . a_dst )
        e = srow[:, h:h + 1] + sall[:, nheads + h:nheads + h + 1].T    # [TILE_M, N]
        e = jnp.where(e > 0, e, alpha * e)                             # LeakyReLU(alpha)
        att = jnp.where(mask, e, neg)                                  # mask non-edges
        m = jnp.max(att, axis=1, keepdims=True)                        # full key dim
        p = jnp.exp(att - m)                                           # unnormalized
        denom = jnp.sum(p, axis=1, keepdims=True)                      # [TILE_M, 1]
        wh_h = wh_ref[:, h * f_out:(h + 1) * f_out]                    # [N, F_out]
        num = jnp.dot(p, wh_h, preferred_element_type=jnp.float32)     # [TILE_M, F_out]
        hp = num * pl.reciprocal(denom, approx=False)                  # normalize after MXU
        if mode == "concat":
            hp = jnp.where(hp > 0, hp, jnp.exp(hp) - 1.0)              # per-head ELU
        cols.append(hp)

    out = cols[0] if nheads == 1 else jnp.concatenate(cols, axis=1)    # [TILE_M, H*F_out]

    if mode == "final":
        # concat=False layer followed by outer F.elu and log_softmax(dim=1)
        out = jnp.where(out > 0, out, jnp.exp(out) - 1.0)
        mm = jnp.max(out, axis=1, keepdims=True)
        lse = jnp.log(jnp.sum(jnp.exp(out - mm), axis=1, keepdims=True)) + mm
        out = out - lse

    out_ref[...] = out.astype(out_ref.dtype)


# ----------------------------------------------------------------------------
# Wrapper: one GraphAttentionLayer over all heads (two pallas_calls)
# ----------------------------------------------------------------------------
def gat_layer(h, adj_i8, W_stack, a_stack, *, alpha, mode):
    nheads, f_in, f_out = W_stack.shape
    N = h.shape[0]
    hf = nheads * f_out
    wid = hf + 2 * nheads

    h = h.astype(jnp.float32)

    # Fold the attention vectors into the projection (parameter-only transform):
    #   x @ [W_all | W@a_src | W@a_dst]  ->  Wh (all heads) + per-head scores.
    a_src = a_stack[:, :f_out, 0]                                   # [H, F_out]
    a_dst = a_stack[:, f_out:, 0]                                   # [H, F_out]
    w_all = jnp.transpose(W_stack, (1, 0, 2)).reshape(f_in, hf)     # [F_in, H*F_out]
    wa_src = jnp.einsum('hfo,ho->fh', W_stack, a_src)               # [F_in, H]
    wa_dst = jnp.einsum('hfo,ho->fh', W_stack, a_dst)               # [F_in, H]
    w_ext = jnp.concatenate([w_all, wa_src, wa_dst], axis=1).astype(jnp.float32)

    # ---- kernel 1: batched projection ----
    tile_p = _pick_tile(N, 512)
    wh, s = pl.pallas_call(
        functools.partial(proj_kernel, hf=hf),
        grid=(N // tile_p,),
        in_specs=[
            pl.BlockSpec((tile_p, f_in), lambda r: (r, 0)),          # x row tile
            pl.BlockSpec((f_in, wid), lambda r: (0, 0)),             # W_ext, resident
        ],
        out_specs=[
            pl.BlockSpec((tile_p, hf), lambda r: (r, 0)),            # Wh rows
            pl.BlockSpec((tile_p, 2 * nheads), lambda r: (r, 0)),    # scores rows
        ],
        out_shape=[
            jax.ShapeDtypeStruct((N, hf), jnp.float32),
            jax.ShapeDtypeStruct((N, 2 * nheads), jnp.float32),
        ],
        compiler_params=pltpu.CompilerParams(
            dimension_semantics=("parallel",),
            vmem_limit_bytes=_VMEM_LIMIT),
        cost_estimate=pl.CostEstimate(
            flops=2 * N * f_in * wid,
            transcendentals=0,
            bytes_accessed=4 * (N * f_in + f_in * wid + N * wid)),
    )(h, w_ext)

    # ---- kernel 2: masked attention over row tiles ----
    tile_m = _pick_tile(N, 256)
    out = pl.pallas_call(
        functools.partial(attn_kernel, nheads=nheads, f_out=f_out,
                          alpha=alpha, mode=mode),
        grid=(N // tile_m,),
        in_specs=[
            pl.BlockSpec((tile_m, N), lambda r: (r, 0)),             # adj rows (int8)
            pl.BlockSpec((N, hf), lambda r: (0, 0)),                 # Wh, resident
            pl.BlockSpec((tile_m, 2 * nheads), lambda r: (r, 0)),    # scores, tile rows
            pl.BlockSpec((N, 2 * nheads), lambda r: (0, 0)),         # scores, all rows
        ],
        out_specs=pl.BlockSpec((tile_m, hf), lambda r: (r, 0)),      # lane-dense concat
        out_shape=jax.ShapeDtypeStruct((N, hf), jnp.float32),
        compiler_params=pltpu.CompilerParams(
            dimension_semantics=("parallel",),
            vmem_limit_bytes=_VMEM_LIMIT),
        cost_estimate=pl.CostEstimate(
            flops=nheads * (2 * N * N * f_out + 8 * N * N),
            transcendentals=nheads * N * N,
            bytes_accessed=N * N + 4 * (2 * N * hf + 4 * N * nheads)),
    )(adj_i8, wh, s, s)
    return out


# ----------------------------------------------------------------------------
# Parameter init (xavier_uniform with gain=1.414, as in the PyTorch module)
# ----------------------------------------------------------------------------
def xavier_uniform(key, shape, gain=1.414):
    fan_in, fan_out = shape[-2], shape[-1]
    bound = gain * (6.0 / (fan_in + fan_out)) ** 0.5
    return jax.random.uniform(key, shape, jnp.float32, minval=-bound, maxval=bound)


def init_gat_params(key, nfeat, nhid, nclass, nheads):
    k1, k2, k3, k4 = jax.random.split(key, 4)
    return {
        "W1": xavier_uniform(k1, (nheads, nfeat, nhid)),
        "a1": xavier_uniform(k2, (nheads, 2 * nhid, 1)),
        "W2": xavier_uniform(k3, (1, nhid * nheads, nclass)),
        "a2": xavier_uniform(k4, (1, 2 * nclass, 1)),
    }


def gat_forward(x, adj, params, *, alpha=0.2):
    # adjacency is only ever used as a mask -> ship it as int8 (4x less HBM/VMEM)
    adj_i8 = (adj > 0).astype(jnp.int8)
    # dropout(x) -> identity (eval mode)
    h1 = gat_layer(x, adj_i8, params["W1"], params["a1"], alpha=alpha,
                   mode="concat")                 # [N, H*nhid], pre-concatenated
    # dropout -> identity; out_att (concat=False) + outer F.elu + log_softmax fused
    out = gat_layer(h1, adj_i8, params["W2"], params["a2"], alpha=alpha,
                    mode="final")                 # [N, nclass]
    return out


# ----------------------------------------------------------------------------
# Pure-JAX reference (mirrors the PyTorch forward in eval mode)
# ----------------------------------------------------------------------------
def _ref_layer(h, adj, W, a, alpha, concat):
    f_out = W.shape[1]
    Wh = h @ W
    e = Wh @ a[:f_out] + (Wh @ a[f_out:]).T
    e = jnp.where(e > 0, e, alpha * e)
    att = jnp.where(adj > 0, e, -9e15)
    att = jax.nn.softmax(att, axis=1)
    hp = att @ Wh
    return jax.nn.elu(hp) if concat else hp


def gat_forward_ref(x, adj, params, *, alpha=0.2):
    heads = [_ref_layer(x, adj, params["W1"][i], params["a1"][i], alpha, True)
             for i in range(params["W1"].shape[0])]
    x_cat = jnp.concatenate(heads, axis=1)
    out = _ref_layer(x_cat, adj, params["W2"][0], params["a2"][0], alpha, False)
    out = jax.nn.elu(out)
    return jax.nn.log_softmax(out, axis=1)


if __name__ == "__main__":
    N, nfeat, nhid, nclass, nheads = 16, 32, 16, 8, 4

    key = jax.random.PRNGKey(0)
    kx, kadj, kp = jax.random.split(key, 3)
    x = jax.random.normal(kx, (N, nfeat), jnp.float32)
    adj = (jax.random.uniform(kadj, (N, N)) > 0.5).astype(jnp.float32)
    adj = adj + jnp.eye(N, dtype=jnp.float32)  # self-loops so no empty rows

    params = init_gat_params(kp, nfeat, nhid, nclass, nheads)

    out = gat_forward(x, adj, params)
    out = jax.block_until_ready(out)

    ref = gat_forward_ref(x, adj, params)
    assert out.shape == (N, nclass), out.shape
    assert jnp.allclose(out, ref, atol=1e-4, rtol=1e-4), float(jnp.max(jnp.abs(out - ref)))

    print("KERNEL_OK")
</pallas_src>

<mosaic_0001>
module attributes {stable_mosaic.version = 11 : i64} {
  func.func @proj_kernel(%arg0: i32, %arg1: memref<16x32xf32, #tpu.memory_space<vmem>>, %arg2: memref<32x72xf32, #tpu.memory_space<vmem>>, %arg3: memref<16x64xf32, #tpu.memory_space<vmem>>, %arg4: memref<16x8xf32, #tpu.memory_space<vmem>>) attributes {dimension_semantics = [#tpu.dimension_semantics<parallel>], iteration_bounds = array<i64: 1>, scalar_prefetch = 0 : i64, scratch_operands = 0 : i64, tpu.core_type = #tpu.core_type<tc>, window_params = [{transform_indices = @transform_0, window_bounds = array<i64: 16, 32>}, {pipeline_mode = #tpu.pipeline_mode<synchronous>, transform_indices = @transform_1, window_bounds = array<i64: 32, 72>}, {transform_indices = @transform_2, window_bounds = array<i64: 16, 64>}, {transform_indices = @transform_3, window_bounds = array<i64: 16, 8>}]} {
    %c0 = arith.constant 0 : index
    %c0_0 = arith.constant 0 : index
    %0 = vector.load %arg1[%c0, %c0_0] : memref<16x32xf32, #tpu.memory_space<vmem>>, vector<16x32xf32>
    %c0_1 = arith.constant 0 : index
    %c0_2 = arith.constant 0 : index
    %1 = vector.load %arg2[%c0_1, %c0_2] : memref<32x72xf32, #tpu.memory_space<vmem>>, vector<32x72xf32>
    %cst = arith.constant dense<0.000000e+00> : vector<16x72xf32>
    %2 = tpu.matmul %0, %1, %cst {dimension_numbers = #tpu.dot_dimension_numbers<[1], [0], [0], [1], [0, 0, 1, 1], [], []>} : vector<16x32xf32>, vector<32x72xf32>, vector<16x72xf32> -> vector<16x72xf32>
    %3 = vector.extract_strided_slice %2 {offsets = [0, 0], sizes = [16, 64], strides = [1, 1]} : vector<16x72xf32> to vector<16x64xf32>
    %c0_3 = arith.constant 0 : index
    %c0_4 = arith.constant 0 : index
    %4 = vector.load %arg3[%c0_3, %c0_4] : memref<16x64xf32, #tpu.memory_space<vmem>>, vector<16x64xf32>
    tpu.vector_store %arg3[%c0_3, %c0_4], %3 {strides = array<i32>} : memref<16x64xf32, #tpu.memory_space<vmem>>, vector<16x64xf32>,
    %5 = vector.extract_strided_slice %2 {offsets = [0, 64], sizes = [16, 8], strides = [1, 1]} : vector<16x72xf32> to vector<16x8xf32>
    %c0_5 = arith.constant 0 : index
    %c0_6 = arith.constant 0 : index
    %6 = vector.load %arg4[%c0_5, %c0_6] : memref<16x8xf32, #tpu.memory_space<vmem>>, vector<16x8xf32>
    tpu.vector_store %arg4[%c0_5, %c0_6], %5 {strides = array<i32>} : memref<16x8xf32, #tpu.memory_space<vmem>>, vector<16x8xf32>,
    return
  }
  func.func @transform_0(%arg0: i32) -> (i32, i32) {
    %c0_i32 = arith.constant 0 : i32
    %c0_i32_0 = arith.constant 0 : i32
    return %arg0, %c0_i32 : i32, i32
  }
  func.func @transform_1(%arg0: i32) -> (i32, i32) {
    %c0_i32 = arith.constant 0 : i32
    %c0_i32_0 = arith.constant 0 : i32
    %c0_i32_1 = arith.constant 0 : i32
    return %c0_i32, %c0_i32_0 : i32, i32
  }
  func.func @transform_2(%arg0: i32) -> (i32, i32) {
    %c0_i32 = arith.constant 0 : i32
    %c0_i32_0 = arith.constant 0 : i32
    return %arg0, %c0_i32 : i32, i32
  }
  func.func @transform_3(%arg0: i32) -> (i32, i32) {
    %c0_i32 = arith.constant 0 : i32
    %c0_i32_0 = arith.constant 0 : i32
    return %arg0, %c0_i32 : i32, i32
  }
}

</mosaic_0001>

<bundles_post_ra>
// kernel: tpu_custom_call.1
= control target key start
LH: loop header
LB: loop body
LE: loop exit
PB: predicated region body
PF: predicated region fallthrough
CT: control target
= control target key end

     0   :  { %9 = vsyncpa [#allocation3], 0  ;;  %s309_s0 = inlined_call_operand.hbm [shape: f32[16,32], index: 0, kind: input, shape index: {}]   ;;  %s310_s1 = inlined_call_operand.hbm [shape: f32[32,72], index: 1, kind: input, shape index: {}]   ;;  %s311_s2 = inlined_call_operand.hbm [shape: f32[16,64], index: 2, kind: output, shape index: {0}]   ;;  %s312_s3 = inlined_call_operand.vmem [shape: f32[16,8], index: 3, kind: output, shape index: {1}]  }
   0x1   :  { %10 = vsyncpa [#allocation6], 0 }
   0x2   :  { %11 = vsyncpa [#allocation4], 0  ;;  %s257_s12 = smov [#allocation2]  }
   0x3   :  { %s17_s13 = sshll.u32 %s257_s12, 4  ;;  %s18_s13 = int_to_ptr.vmem [resolvable:$true] %s17_s13 }
   0x4   :  { %s199_s14 = scalar_lea.vmem %s18_s13, 256  ;;  %p204_p1 = scmp.lt.s32.totalorder %s18_s13, %s18_s13 }
   0x5   :  { %p200_p0 = scmp.ne.s32.totalorder %s18_s13, %s199_s14  ;;  %p205_p2 = scmp.lt.s32.totalorder %s199_s14, %s199_s14 }
   0x7   :  { %p206_p3 = por %p205_p2, %p204_p1 }
   0x9   :  { %p207_p4 = pnand %p206_p3, %p200_p0 }
   0xb   :  { %210 = shalt.err (!%p207_p4)
}
   0xc   :  { %s258_s15 = smov 128   ;;  %s259_s16 = smov 8  }
   0xd   :  { %23 = dma.hbm_to_vmem [thread:$0]  %s309_s0, 256, %s18_s13, [#allocation3], %s258_s15, %s258_s15, %s259_s16  }
   0xe   :  { %s260_s19 = smov [#allocation5]  }
   0xf   :  { %s29_s20 = sshll.u32 %s260_s19, 4  ;;  %s30_s20 = int_to_ptr.vmem [resolvable:$true] %s29_s20 }
  0x10   :  { %s219_s21 = scalar_lea.vmem %s30_s20, 512  ;;  %p224_p6 = scmp.lt.s32.totalorder %s30_s20, %s30_s20 }
  0x11   :  { %p220_p5 = scmp.ne.s32.totalorder %s30_s20, %s219_s21  ;;  %p225_p7 = scmp.lt.s32.totalorder %s219_s21, %s219_s21 }
  0x13   :  { %p226_p8 = por %p225_p7, %p224_p6 }
  0x15   :  { %p227_p9 = pnand %p226_p8, %p220_p5 }
  0x17   :  { %230 = shalt.err (!%p227_p9)
}
  0x18   :  { %35 = dma.hbm_to_vmem [thread:$0]  %s310_s1, 512, %s30_s20, [#allocation6], %s258_s15, %s258_s15, %s259_s16  }
  0x19   :  { %251 = dma.done.wait [#allocation3], 256  }
  0x1a   :  { %252 = vsyncadd [#allocation3], 4294967040 }
  0x1b   :  { %253 = dma.done.wait [#allocation6], 512  }
  0x1c   :  { %254 = vsyncadd [#allocation6], 4294966784  ;;  %vm48_vm0 = vcmask 261120   ;;  %v47_v0 = vld [vmem:[#allocation5 + $0x18] sm:$0xff]  ;;  %v46_v1 = vld [vmem:[#allocation5 + $0x10] sm:$0xff]  ;;  %vm130_vm1 = vcmask 523264  }
  0x1d   :  { %174 = vmatprep.subr.mxu0 %v47_v0  ;;  %v42_v2 = vld [vmem:[#allocation2] sm:$0xff]  ;;  %v45_v3 = vld [vmem:[#allocation5 + $0x8] sm:$0xff]  ;;  %v44_v4 = vld [vmem:[#allocation5] sm:$0xff]  ;;  %s261_s0 = smov [#allocation7]   ;;  %s262_s24 = smov 64  }
  0x1e   :  { %175 = vmatpush3.msra.mxu0 %v47_v0  ;;  %182 = vmatprep.mubr.msk.f32.mxu0 %vm48_vm0, %v42_v2  ;;  %v43_v5 = vld [vmem:[#allocation2 + $0x8] sm:$0xff]  ;;  %s149_s1 = sshll.u32 %s261_s0, 4  ;;  %s150_s1 = int_to_ptr.vmem [resolvable:$true] %s149_s1 }
  0x1f   :  { %176 = vmatprep.subr.mxu0 %v46_v1  ;;  %s231_s25 = scalar_lea.vmem %s150_s1, 256  ;;  %p236_p11 = scmp.lt.s32.totalorder %s150_s1, %s150_s1 }
  0x20   :  { %177 = vmatpush3.msra.mxu0 %v46_v1  ;;  %p232_p10 = scmp.ne.s32.totalorder %s150_s1, %s231_s25  ;;  %p237_p12 = scmp.lt.s32.totalorder %s231_s25, %s231_s25 }
  0x21   :  { %178 = vmatprep.subr.mxu0 %v45_v3 }
  0x22   :  { %179 = vmatpush3.msra.mxu0 %v45_v3  ;;  %p238_p13 = por %p237_p12, %p236_p11 }
  0x23   :  { %180 = vmatprep.subr.mxu0 %v44_v4 }
  0x24   :  { %181 = vmatpush3.msra.mxu0 %v44_v4  ;;  %p239_p0 = pnand %p238_p13, %p232_p10 }
  0x25   :  { %183 = vmatmul.mubr.msk.f32.vlgmr.msra.gmra.mxu0 %vm48_vm0, %v43_v5 }
  0xe5   :  { %v184_v6 = vpop.f32.mrf.mxu0 }
  0xe6   :  { %132 = vst.msk [vmem:[#allocation7 + $0x8] sm:$0xff] %vm130_vm1, %v184_v6 }
  0xe7   :  { %v121_v7 = vpop.f32.mrf.mxu0 }
  0xe8   :  { %131 = vst.msk [vmem:[#allocation7] sm:$0xff] %vm130_vm1, %v121_v7  ;;  %135 = vrot.lane.b32.xlu0 %v121_v7, %s262_s24 }
  0xe9   :  { %242 = shalt.err (!%p239_p0)
}
  0xea   :  { %155 = dma.vmem_to_hbm [thread:$0]  %s150_s1, 256, %s311_s2, [#allocation4], %s258_s15, %s258_s15, %s259_s16   ;;  %vm141_vm2 = vcmask 64512  }
  0xec   :  { %137 = vrot.lane.b32.xlu0 %v184_v6, %s262_s24 }
 0x15a   :  { %v136_v8 = vpop.permute.xlu0 %135 }
 0x15b   :  { %142 = vst.msk [vmem:[%s312_s3] sm:$0xff] %vm141_vm2, %v136_v8 }
 0x15e   :  { %v138_v9 = vpop.permute.xlu0 %137 }
 0x15f   :  { %143 = vst.msk [vmem:[%s312_s3 + $0x8] sm:$0xff] %vm141_vm2, %v138_v9 }
 0x160   :  { %255 = dma.done.wait [#allocation4], 256  }
 0x161   :  { %256 = vsyncadd [#allocation4], 4294967040 }
 0x162   :  { %163 = vsyncpa [#allocation3], 1 }
 0x163   :  { %164 = vsyncpa [#allocation6], 1 }
 0x164   :  { %165 = vsyncpa [#allocation4], 1 }

</bundles_post_ra>
